<compile_context>
chip_gen: v7x
topology: tpu7x:2x2x1
jax: 0.10.0
libtpu: 0.0.40
codegen_flags: <defaults>
</compile_context>

<pallas_src>
import jax
import jax.numpy as jnp
from jax import lax
from jax.experimental import pallas as pl
from jax.experimental.pallas import tpu as pltpu


# ----------------------------------------------------------------------------
# One-time parameter packing (hoisted out of the per-forward path).
# Packed layout, shape (2H + f + 4, 4H), f32:
#   rows [0,   H/2) : W_ih^T rows consumed by x_o
#   rows [H/2, H  ) : W_ih^T rows consumed by x_a
#   rows [H,   2H ) : W_hh^T
#   rows [2H, 2H+f) : W_body^T      (cols [0, H/2))
#   row  2H+f       : w_action row  (cols [0, H/2))
#   row  2H+f+1     : w_q row       (cols [0, H))
#   row  2H+f+2     : b_ih + b_hh   (cols [0, 4H))
#   row  2H+f+3     : [b_body | b_action | b_q | 0...]
# ----------------------------------------------------------------------------
def pack_params(params, f, hidden_size):
    H = hidden_size
    assert H % 2 == 0
    H2 = H // 2
    G = 4 * H
    rows = 2 * H + f + 4
    P = jnp.zeros((rows, G), jnp.float32)
    P = P.at[0:H, :].set(params["wih_t"])                 # rows 0:H/2 -> x_o half
    P = P.at[H:2 * H, :].set(params["whh_t"])
    P = P.at[2 * H:2 * H + f, 0:H2].set(params["wb_t"])
    P = P.at[2 * H + f, 0:H2].set(params["wa_t"][0])
    P = P.at[2 * H + f + 1, 0:H].set(params["wq_t"][:, 0])
    P = P.at[2 * H + f + 2, :].set(params["bih"] + params["bhh"])
    P = P.at[2 * H + f + 3, 0:H2].set(params["bb"])
    P = P.at[2 * H + f + 3, H2:H].set(params["ba"])
    P = P.at[2 * H + f + 3, H].set(params["bq"][0])
    return P


def _critic_forward_kernel(obs_ref, act_ref, hx_ref, cx_ref, p_ref,
                           q_ref, gates_scr, h_all_scr):
    """Whole forward pass in one grid-less invocation.

    obs_ref : (batch*seq, f)  batch-major flattened observations
    act_ref : (batch*seq, 1)  batch-major flattened actions
    hx_ref, cx_ref : (batch, H) initial LSTM state
    p_ref   : (2H+f+4, 4H)    packed parameters (see pack_params)
    q_ref   : (batch*seq, 1)  output, batch-major
    gates_scr : (batch*seq, 4H) VMEM scratch for the input half of the gates
    h_all_scr : (batch*seq, H)  VMEM scratch holding every h_t (batch-major)
    """
    batch, H = hx_ref.shape
    f = obs_ref.shape[1]
    n_rows = obs_ref.shape[0]
    seq = n_rows // batch                      # static at trace time
    H2 = H // 2

    r_wb = 2 * H
    r_wa = r_wb + f
    r_wq = r_wa + 1
    r_bg = r_wq + 1
    r_b2 = r_bg + 1

    # ---- unpack packed parameters (static slices, one-time loads) ----------
    wih_o = p_ref[0:H2, :]                     # (H/2, 4H) multiplied by x_o
    wih_a = p_ref[H2:H, :]                     # (H/2, 4H) multiplied by x_a
    wb = p_ref[r_wb:r_wb + f, 0:H2]            # (f, H/2)
    wa = p_ref[r_wa:r_wa + 1, 0:H2]            # (1, H/2)
    wq = p_ref[r_wq:r_wq + 1, 0:H]             # (1, H)
    bg = p_ref[r_bg:r_bg + 1, :]               # (1, 4H)  = b_ih + b_hh
    bb = p_ref[r_b2:r_b2 + 1, 0:H2]            # (1, H/2)
    ba = p_ref[r_b2:r_b2 + 1, H2:H]            # (1, H/2)
    bq = p_ref[r_b2:r_b2 + 1, H:H + 1]         # (1, 1)

    # ---- prologue: dense over all batch*seq rows (row order irrelevant) ----
    obs = obs_ref[...]                         # (batch*seq, f)
    act = act_ref[...]                         # (batch*seq, 1)

    # body: obs -> ReLU(Linear), one dense matmul over every timestep.
    x_o = jnp.maximum(
        jnp.dot(obs, wb, preferred_element_type=jnp.float32) + bb, 0.0)
    # encode_action: K == 1, so a VPU broadcast instead of an MXU push.
    x_a = jnp.maximum(act * wa + ba, 0.0)

    # Input contribution of the gates for all timesteps; W_ih split so no
    # lane-dim concat([x_o, x_a]) is needed.  Gate order: i, f, g, o.
    gates_scr[...] = (
        jnp.dot(x_o, wih_o, preferred_element_type=jnp.float32)
        + jnp.dot(x_a, wih_a, preferred_element_type=jnp.float32)
        + bg)                                  # (batch*seq, 4H), batch-major

    # ---- serial recurrence: only h @ W_hh remains inside the loop ----------
    whh = p_ref[H:2 * H, :]                    # (H, 4H), resident across loop

    def step(t, carry):
        h, c = carry
        # Timestep t of the batch-major buffer = rows {t + b*seq : b}.
        g = (gates_scr[pl.ds(t, batch, stride=seq), :]
             + jnp.dot(h, whh, preferred_element_type=jnp.float32))
        if H < 128:
            # Whole-vreg nonlinearities: 2 full EUP passes instead of 4
            # partial-width ones when a gate slice is narrower than a lane
            # group.
            sg = jax.nn.sigmoid(g)
            th = jnp.tanh(g)
            i_g = sg[:, 0 * H:1 * H]
            f_g = sg[:, 1 * H:2 * H]
            g_g = th[:, 2 * H:3 * H]
            o_g = sg[:, 3 * H:4 * H]
        else:
            i_g = jax.nn.sigmoid(g[:, 0 * H:1 * H])
            f_g = jax.nn.sigmoid(g[:, 1 * H:2 * H])
            g_g = jnp.tanh(g[:, 2 * H:3 * H])
            o_g = jax.nn.sigmoid(g[:, 3 * H:4 * H])
        c = f_g * c + i_g * g_g
        h = o_g * jnp.tanh(c)
        h_all_scr[pl.ds(t, batch, stride=seq), :] = h      # batch-major rows
        return h, c

    lax.fori_loop(0, seq, step, (hx_ref[...], cx_ref[...]), unroll=True)

    # ---- epilogue: q head once, VPU multiply + lane reduction --------------
    q_ref[...] = (jnp.sum(h_all_scr[...] * wq, axis=-1, keepdims=True)
                  + bq)                        # (batch*seq, 1), batch-major


def mlp_lstm_critic_continuous_forward(obs, act, lstm_hxs, packed_params):
    """Equivalent of MlpLSTMCriticContinuous.forward.

    obs : (batch, seq, f) float32
    act : (batch, seq, 1) float32
    lstm_hxs : tuple (hx, cx), each (batch, H) float32
    packed_params : output of pack_params (built once, reused every call)
    returns q_value : (batch, seq, 1) float32
    """
    hx, cx = lstm_hxs
    batch, seq, f = obs.shape
    G = packed_params.shape[1]
    H = G // 4
    assert packed_params.shape[0] == 2 * H + f + 4
    assert hx.shape == (batch, H) and cx.shape == (batch, H)

    # Batch-major flattening: pure reshapes, no HBM-roundtrip transposes.
    obs_flat = obs.reshape(batch * seq, f)
    act_flat = act.reshape(batch * seq, 1)

    q_flat = pl.pallas_call(
        _critic_forward_kernel,
        out_shape=jax.ShapeDtypeStruct((batch * seq, 1), jnp.float32),
        scratch_shapes=[pltpu.VMEM((batch * seq, G), jnp.float32),
                        pltpu.VMEM((batch * seq, H), jnp.float32)],
        compiler_params=pltpu.CompilerParams(
            vmem_limit_bytes=32 * 1024 * 1024),
    )(obs_flat, act_flat, hx, cx, packed_params)

    # Batch-major output -> (batch, seq, 1) is a free reshape.
    return q_flat.reshape(batch, seq, 1)


def _reference_forward(obs, act, lstm_hxs, params):
    """Pure-JAX reference mirroring the PyTorch module exactly."""
    hx, cx = lstm_hxs
    batch, seq, f = obs.shape
    H = params["whh_t"].shape[0]
    H2 = H // 2

    x_o = jnp.maximum(obs.reshape(batch * seq, f) @ params["wb_t"]
                      + params["bb"], 0.0).reshape(batch, seq, H2)
    x_a = jnp.maximum(act.reshape(batch * seq, 1) @ params["wa_t"]
                      + params["ba"], 0.0).reshape(batch, seq, H2)
    x = jnp.concatenate([x_o, x_a], axis=-1)

    bg = params["bih"] + params["bhh"]
    outs = []
    h, c = hx, cx
    for t in range(seq):
        gates = x[:, t] @ params["wih_t"] + h @ params["whh_t"] + bg
        i_g = jax.nn.sigmoid(gates[:, 0 * H:1 * H])
        f_g = jax.nn.sigmoid(gates[:, 1 * H:2 * H])
        g_g = jnp.tanh(gates[:, 2 * H:3 * H])
        o_g = jax.nn.sigmoid(gates[:, 3 * H:4 * H])
        c = f_g * c + i_g * g_g
        h = o_g * jnp.tanh(c)
        outs.append(h)
    out = jnp.stack(outs, axis=1)                       # (batch, seq, H)
    q = out @ params["wq_t"] + params["bq"]             # (batch, seq, 1)
    return q


def _init_params(key, f, hidden_size):
    """Deterministic synthetic parameters (shapes match the PyTorch module)."""
    H = hidden_size
    H2 = H // 2
    ks = jax.random.split(key, 10)
    u = lambda k, shape, scale: jax.random.uniform(
        k, shape, jnp.float32, -scale, scale)
    return {
        # body: Linear(f -> H/2)   (stored transposed for right-multiply)
        "wb_t": u(ks[0], (f, H2), 1.0 / jnp.sqrt(f)),
        "bb":   u(ks[1], (H2,),   1.0 / jnp.sqrt(f)),
        # encode_action: Linear(1 -> H/2)
        "wa_t": u(ks[2], (1, H2), 1.0),
        "ba":   u(ks[3], (H2,),   1.0),
        # LSTMCell(H -> H): W_ih (4H, H), W_hh (4H, H) stored transposed
        "wih_t": u(ks[4], (H, 4 * H), 1.0 / jnp.sqrt(H)),
        "whh_t": u(ks[5], (H, 4 * H), 1.0 / jnp.sqrt(H)),
        "bih":   u(ks[6], (4 * H,),   1.0 / jnp.sqrt(H)),
        "bhh":   u(ks[7], (4 * H,),   1.0 / jnp.sqrt(H)),
        # q_value: Linear(H -> 1)
        "wq_t": u(ks[8], (H, 1), 1.0 / jnp.sqrt(H)),
        "bq":   u(ks[9], (1,),   1.0 / jnp.sqrt(H)),
    }


if __name__ == "__main__":
    batch, seq, f, hidden = 2, 8, 4, 32

    key = jax.random.PRNGKey(0)
    k_obs, k_act, k_h, k_c, k_par = jax.random.split(key, 5)

    obs = jax.random.normal(k_obs, (batch, seq, f), jnp.float32)
    act = jax.random.normal(k_act, (batch, seq, 1), jnp.float32)
    hx = jax.random.normal(k_h, (batch, hidden), jnp.float32)
    cx = jax.random.normal(k_c, (batch, hidden), jnp.float32)
    params = _init_params(k_par, f, hidden)

    # One-time parameter packing (steady state reuses `packed`).
    packed = pack_params(params, f, hidden)

    q = mlp_lstm_critic_continuous_forward(obs, act, (hx, cx), packed)
    q = jax.block_until_ready(q)

    q_ref = _reference_forward(obs, act, (hx, cx), params)
    assert q.shape == (batch, seq, 1), q.shape
    assert jnp.allclose(q, q_ref, atol=2e-5, rtol=2e-5), (
        float(jnp.max(jnp.abs(q - q_ref))))

    print("KERNEL_OK")
</pallas_src>

<mosaic_0001>
module attributes {stable_mosaic.version = 11 : i64} {
  func.func @_critic_forward_kernel(%arg0: memref<16x4xf32, #tpu.memory_space<vmem>>, %arg1: memref<16x1xf32, #tpu.memory_space<vmem>>, %arg2: memref<2x32xf32, #tpu.memory_space<vmem>>, %arg3: memref<2x32xf32, #tpu.memory_space<vmem>>, %arg4: memref<72x128xf32, #tpu.memory_space<vmem>>, %arg5: memref<16x1xf32, #tpu.memory_space<vmem>>, %arg6: memref<16x128xf32, #tpu.memory_space<vmem>>, %arg7: memref<16x32xf32, #tpu.memory_space<vmem>>) attributes {dimension_semantics = [], scalar_prefetch = 0 : i64, scratch_operands = 2 : i64, tpu.core_type = #tpu.core_type<tc>} {
    %c0 = arith.constant 0 : index
    %c0_0 = arith.constant 0 : index
    %0 = vector.load %arg4[%c0, %c0_0] : memref<72x128xf32, #tpu.memory_space<vmem>>, vector<16x128xf32>
    %c16 = arith.constant 16 : index
    %c0_1 = arith.constant 0 : index
    %1 = vector.load %arg4[%c16, %c0_1] : memref<72x128xf32, #tpu.memory_space<vmem>>, vector<16x128xf32>
    %c64 = arith.constant 64 : index
    %c0_2 = arith.constant 0 : index
    %2 = vector.load %arg4[%c64, %c0_2] : memref<72x128xf32, #tpu.memory_space<vmem>>, vector<4x16xf32>
    %c68 = arith.constant 68 : index
    %c0_3 = arith.constant 0 : index
    %3 = vector.load %arg4[%c68, %c0_3] : memref<72x128xf32, #tpu.memory_space<vmem>>, vector<1x16xf32>
    %c69 = arith.constant 69 : index
    %c0_4 = arith.constant 0 : index
    %4 = vector.load %arg4[%c69, %c0_4] : memref<72x128xf32, #tpu.memory_space<vmem>>, vector<1x32xf32>
    %c70 = arith.constant 70 : index
    %c0_5 = arith.constant 0 : index
    %5 = vector.load %arg4[%c70, %c0_5] : memref<72x128xf32, #tpu.memory_space<vmem>>, vector<1x128xf32>
    %c71 = arith.constant 71 : index
    %c0_6 = arith.constant 0 : index
    %6 = vector.load %arg4[%c71, %c0_6] : memref<72x128xf32, #tpu.memory_space<vmem>>, vector<1x16xf32>
    %c71_7 = arith.constant 71 : index
    %c16_8 = arith.constant 16 : index
    %7 = vector.load %arg4[%c71_7, %c16_8] : memref<72x128xf32, #tpu.memory_space<vmem>>, vector<1x16xf32>
    %c71_9 = arith.constant 71 : index
    %c32 = arith.constant 32 : index
    %8 = vector.load %arg4[%c71_9, %c32] : memref<72x128xf32, #tpu.memory_space<vmem>>, vector<1x1xf32>
    %c0_10 = arith.constant 0 : index
    %c0_11 = arith.constant 0 : index
    %9 = vector.load %arg0[%c0_10, %c0_11] : memref<16x4xf32, #tpu.memory_space<vmem>>, vector<16x4xf32>
    %c0_12 = arith.constant 0 : index
    %c0_13 = arith.constant 0 : index
    %10 = vector.load %arg1[%c0_12, %c0_13] : memref<16x1xf32, #tpu.memory_space<vmem>>, vector<16x1xf32>
    %cst = arith.constant dense<0.000000e+00> : vector<16x16xf32>
    %11 = tpu.matmul %9, %2, %cst {dimension_numbers = #tpu.dot_dimension_numbers<[1], [0], [0], [1], [0, 0, 1, 1], [], []>} : vector<16x4xf32>, vector<4x16xf32>, vector<16x16xf32> -> vector<16x16xf32>
    %12 = vector.broadcast %6 : vector<1x16xf32> to vector<16x16xf32>
    %13 = arith.addf %11, %12 : vector<16x16xf32>
    %cst_14 = arith.constant 0.000000e+00 : f32
    %14 = vector.broadcast %cst_14 : f32 to vector<16x16xf32>
    %15 = arith.maximumf %13, %14 : vector<16x16xf32>
    %16 = vector.broadcast %10 : vector<16x1xf32> to vector<16x16xf32>
    %17 = vector.broadcast %3 : vector<1x16xf32> to vector<16x16xf32>
    %18 = arith.mulf %16, %17 : vector<16x16xf32>
    %19 = vector.broadcast %7 : vector<1x16xf32> to vector<16x16xf32>
    %20 = arith.addf %18, %19 : vector<16x16xf32>
    %cst_15 = arith.constant 0.000000e+00 : f32
    %21 = vector.broadcast %cst_15 : f32 to vector<16x16xf32>
    %22 = arith.maximumf %20, %21 : vector<16x16xf32>
    %cst_16 = arith.constant dense<0.000000e+00> : vector<16x128xf32>
    %23 = tpu.matmul %15, %0, %cst_16 {dimension_numbers = #tpu.dot_dimension_numbers<[1], [0], [0], [1], [0, 0, 1, 1], [], []>} : vector<16x16xf32>, vector<16x128xf32>, vector<16x128xf32> -> vector<16x128xf32>
    %cst_17 = arith.constant dense<0.000000e+00> : vector<16x128xf32>
    %24 = tpu.matmul %22, %1, %cst_17 {dimension_numbers = #tpu.dot_dimension_numbers<[1], [0], [0], [1], [0, 0, 1, 1], [], []>} : vector<16x16xf32>, vector<16x128xf32>, vector<16x128xf32> -> vector<16x128xf32>
    %25 = arith.addf %23, %24 : vector<16x128xf32>
    %26 = vector.broadcast %5 : vector<1x128xf32> to vector<16x128xf32>
    %27 = arith.addf %25, %26 : vector<16x128xf32>
    %c0_18 = arith.constant 0 : index
    %c0_19 = arith.constant 0 : index
    %28 = vector.load %arg6[%c0_18, %c0_19] : memref<16x128xf32, #tpu.memory_space<vmem>>, vector<16x128xf32>
    tpu.vector_store %arg6[%c0_18, %c0_19], %27 {strides = array<i32>} : memref<16x128xf32, #tpu.memory_space<vmem>>, vector<16x128xf32>,
    %c32_20 = arith.constant 32 : index
    %c0_21 = arith.constant 0 : index
    %29 = vector.load %arg4[%c32_20, %c0_21] : memref<72x128xf32, #tpu.memory_space<vmem>>, vector<32x128xf32>
    %c0_22 = arith.constant 0 : index
    %c0_23 = arith.constant 0 : index
    %30 = vector.load %arg2[%c0_22, %c0_23] : memref<2x32xf32, #tpu.memory_space<vmem>>, vector<2x32xf32>
    %c0_24 = arith.constant 0 : index
    %c0_25 = arith.constant 0 : index
    %31 = vector.load %arg3[%c0_24, %c0_25] : memref<2x32xf32, #tpu.memory_space<vmem>>, vector<2x32xf32>
    %c0_i32 = arith.constant 0 : i32
    %32 = arith.index_cast %c0_i32 : i32 to index
    %c0_26 = arith.constant 0 : index
    %33 = tpu.strided_load %arg6[%32, %c0_26] {strides = array<i32: 8, 1>} : memref<16x128xf32, #tpu.memory_space<vmem>>, vector<2x128xf32>
    %cst_27 = arith.constant dense<0.000000e+00> : vector<2x128xf32>
    %34 = tpu.matmul %30, %29, %cst_27 {dimension_numbers = #tpu.dot_dimension_numbers<[1], [0], [0], [1], [0, 0, 1, 1], [], []>} : vector<2x32xf32>, vector<32x128xf32>, vector<2x128xf32> -> vector<2x128xf32>
    %35 = arith.addf %33, %34 : vector<2x128xf32>
    %36 = arith.negf %35 : vector<2x128xf32>
    %37 = math.exp %36 : vector<2x128xf32>
    %cst_28 = arith.constant 1.000000e+00 : f32
    %38 = vector.broadcast %cst_28 : f32 to vector<2x128xf32>
    %39 = arith.addf %38, %37 : vector<2x128xf32>
    %40 = arith.divf %38, %39 : vector<2x128xf32>
    %41 = math.tanh %35 : vector<2x128xf32>
    %42 = vector.extract_strided_slice %40 {offsets = [0, 0], sizes = [2, 32], strides = [1, 1]} : vector<2x128xf32> to vector<2x32xf32>
    %43 = vector.extract_strided_slice %40 {offsets = [0, 32], sizes = [2, 32], strides = [1, 1]} : vector<2x128xf32> to vector<2x32xf32>
    %44 = vector.extract_strided_slice %41 {offsets = [0, 64], sizes = [2, 32], strides = [1, 1]} : vector<2x128xf32> to vector<2x32xf32>
    %45 = vector.extract_strided_slice %40 {offsets = [0, 96], sizes = [2, 32], strides = [1, 1]} : vector<2x128xf32> to vector<2x32xf32>
    %46 = arith.mulf %43, %31 : vector<2x32xf32>
    %47 = arith.mulf %42, %44 : vector<2x32xf32>
    %48 = arith.addf %46, %47 : vector<2x32xf32>
    %49 = math.tanh %48 : vector<2x32xf32>
    %50 = arith.mulf %45, %49 : vector<2x32xf32>
    %51 = arith.index_cast %c0_i32 : i32 to index
    %c0_29 = arith.constant 0 : index
    %52 = tpu.strided_load %arg7[%51, %c0_29] {strides = array<i32: 8, 1>} : memref<16x32xf32, #tpu.memory_space<vmem>>, vector<2x32xf32>
    tpu.strided_store %arg7[%51, %c0_29], %50 {strides = array<i32: 8, 1>} : memref<16x32xf32, #tpu.memory_space<vmem>>, vector<2x32xf32>
    %c1_i32 = arith.constant 1 : i32
    %53 = arith.index_cast %c1_i32 : i32 to index
    %c0_30 = arith.constant 0 : index
    %54 = tpu.strided_load %arg6[%53, %c0_30] {strides = array<i32: 8, 1>} : memref<16x128xf32, #tpu.memory_space<vmem>>, vector<2x128xf32>
    %cst_31 = arith.constant dense<0.000000e+00> : vector<2x128xf32>
    %55 = tpu.matmul %50, %29, %cst_31 {dimension_numbers = #tpu.dot_dimension_numbers<[1], [0], [0], [1], [0, 0, 1, 1], [], []>} : vector<2x32xf32>, vector<32x128xf32>, vector<2x128xf32> -> vector<2x128xf32>
    %56 = arith.addf %54, %55 : vector<2x128xf32>
    %57 = arith.negf %56 : vector<2x128xf32>
    %58 = math.exp %57 : vector<2x128xf32>
    %cst_32 = arith.constant 1.000000e+00 : f32
    %59 = vector.broadcast %cst_32 : f32 to vector<2x128xf32>
    %60 = arith.addf %59, %58 : vector<2x128xf32>
    %61 = arith.divf %59, %60 : vector<2x128xf32>
    %62 = math.tanh %56 : vector<2x128xf32>
    %63 = vector.extract_strided_slice %61 {offsets = [0, 0], sizes = [2, 32], strides = [1, 1]} : vector<2x128xf32> to vector<2x32xf32>
    %64 = vector.extract_strided_slice %61 {offsets = [0, 32], sizes = [2, 32], strides = [1, 1]} : vector<2x128xf32> to vector<2x32xf32>
    %65 = vector.extract_strided_slice %62 {offsets = [0, 64], sizes = [2, 32], strides = [1, 1]} : vector<2x128xf32> to vector<2x32xf32>
    %66 = vector.extract_strided_slice %61 {offsets = [0, 96], sizes = [2, 32], strides = [1, 1]} : vector<2x128xf32> to vector<2x32xf32>
    %67 = arith.mulf %64, %48 : vector<2x32xf32>
    %68 = arith.mulf %63, %65 : vector<2x32xf32>
    %69 = arith.addf %67, %68 : vector<2x32xf32>
    %70 = math.tanh %69 : vector<2x32xf32>
    %71 = arith.mulf %66, %70 : vector<2x32xf32>
    %72 = arith.index_cast %c1_i32 : i32 to index
    %c0_33 = arith.constant 0 : index
    %73 = tpu.strided_load %arg7[%72, %c0_33] {strides = array<i32: 8, 1>} : memref<16x32xf32, #tpu.memory_space<vmem>>, vector<2x32xf32>
    tpu.strided_store %arg7[%72, %c0_33], %71 {strides = array<i32: 8, 1>} : memref<16x32xf32, #tpu.memory_space<vmem>>, vector<2x32xf32>
    %c2_i32 = arith.constant 2 : i32
    %74 = arith.index_cast %c2_i32 : i32 to index
    %c0_34 = arith.constant 0 : index
    %75 = tpu.strided_load %arg6[%74, %c0_34] {strides = array<i32: 8, 1>} : memref<16x128xf32, #tpu.memory_space<vmem>>, vector<2x128xf32>
    %cst_35 = arith.constant dense<0.000000e+00> : vector<2x128xf32>
    %76 = tpu.matmul %71, %29, %cst_35 {dimension_numbers = #tpu.dot_dimension_numbers<[1], [0], [0], [1], [0, 0, 1, 1], [], []>} : vector<2x32xf32>, vector<32x128xf32>, vector<2x128xf32> -> vector<2x128xf32>
    %77 = arith.addf %75, %76 : vector<2x128xf32>
    %78 = arith.negf %77 : vector<2x128xf32>
    %79 = math.exp %78 : vector<2x128xf32>
    %cst_36 = arith.constant 1.000000e+00 : f32
    %80 = vector.broadcast %cst_36 : f32 to vector<2x128xf32>
    %81 = arith.addf %80, %79 : vector<2x128xf32>
    %82 = arith.divf %80, %81 : vector<2x128xf32>
    %83 = math.tanh %77 : vector<2x128xf32>
    %84 = vector.extract_strided_slice %82 {offsets = [0, 0], sizes = [2, 32], strides = [1, 1]} : vector<2x128xf32> to vector<2x32xf32>
    %85 = vector.extract_strided_slice %82 {offsets = [0, 32], sizes = [2, 32], strides = [1, 1]} : vector<2x128xf32> to vector<2x32xf32>
    %86 = vector.extract_strided_slice %83 {offsets = [0, 64], sizes = [2, 32], strides = [1, 1]} : vector<2x128xf32> to vector<2x32xf32>
    %87 = vector.extract_strided_slice %82 {offsets = [0, 96], sizes = [2, 32], strides = [1, 1]} : vector<2x128xf32> to vector<2x32xf32>
    %88 = arith.mulf %85, %69 : vector<2x32xf32>
    %89 = arith.mulf %84, %86 : vector<2x32xf32>
    %90 = arith.addf %88, %89 : vector<2x32xf32>
    %91 = math.tanh %90 : vector<2x32xf32>
    %92 = arith.mulf %87, %91 : vector<2x32xf32>
    %93 = arith.index_cast %c2_i32 : i32 to index
    %c0_37 = arith.constant 0 : index
    %94 = tpu.strided_load %arg7[%93, %c0_37] {strides = array<i32: 8, 1>} : memref<16x32xf32, #tpu.memory_space<vmem>>, vector<2x32xf32>
    tpu.strided_store %arg7[%93, %c0_37], %92 {strides = array<i32: 8, 1>} : memref<16x32xf32, #tpu.memory_space<vmem>>, vector<2x32xf32>
    %c3_i32 = arith.constant 3 : i32
    %95 = arith.index_cast %c3_i32 : i32 to index
    %c0_38 = arith.constant 0 : index
    %96 = tpu.strided_load %arg6[%95, %c0_38] {strides = array<i32: 8, 1>} : memref<16x128xf32, #tpu.memory_space<vmem>>, vector<2x128xf32>
    %cst_39 = arith.constant dense<0.000000e+00> : vector<2x128xf32>
    %97 = tpu.matmul %92, %29, %cst_39 {dimension_numbers = #tpu.dot_dimension_numbers<[1], [0], [0], [1], [0, 0, 1, 1], [], []>} : vector<2x32xf32>, vector<32x128xf32>, vector<2x128xf32> -> vector<2x128xf32>
    %98 = arith.addf %96, %97 : vector<2x128xf32>
    %99 = arith.negf %98 : vector<2x128xf32>
    %100 = math.exp %99 : vector<2x128xf32>
    %cst_40 = arith.constant 1.000000e+00 : f32
    %101 = vector.broadcast %cst_40 : f32 to vector<2x128xf32>
    %102 = arith.addf %101, %100 : vector<2x128xf32>
    %103 = arith.divf %101, %102 : vector<2x128xf32>
    %104 = math.tanh %98 : vector<2x128xf32>
    %105 = vector.extract_strided_slice %103 {offsets = [0, 0], sizes = [2, 32], strides = [1, 1]} : vector<2x128xf32> to vector<2x32xf32>
    %106 = vector.extract_strided_slice %103 {offsets = [0, 32], sizes = [2, 32], strides = [1, 1]} : vector<2x128xf32> to vector<2x32xf32>
    %107 = vector.extract_strided_slice %104 {offsets = [0, 64], sizes = [2, 32], strides = [1, 1]} : vector<2x128xf32> to vector<2x32xf32>
    %108 = vector.extract_strided_slice %103 {offsets = [0, 96], sizes = [2, 32], strides = [1, 1]} : vector<2x128xf32> to vector<2x32xf32>
    %109 = arith.mulf %106, %90 : vector<2x32xf32>
    %110 = arith.mulf %105, %107 : vector<2x32xf32>
    %111 = arith.addf %109, %110 : vector<2x32xf32>
    %112 = math.tanh %111 : vector<2x32xf32>
    %113 = arith.mulf %108, %112 : vector<2x32xf32>
    %114 = arith.index_cast %c3_i32 : i32 to index
    %c0_41 = arith.constant 0 : index
    %115 = tpu.strided_load %arg7[%114, %c0_41] {strides = array<i32: 8, 1>} : memref<16x32xf32, #tpu.memory_space<vmem>>, vector<2x32xf32>
    tpu.strided_store %arg7[%114, %c0_41], %113 {strides = array<i32: 8, 1>} : memref<16x32xf32, #tpu.memory_space<vmem>>, vector<2x32xf32>
    %c4_i32 = arith.constant 4 : i32
    %116 = arith.index_cast %c4_i32 : i32 to index
    %c0_42 = arith.constant 0 : index
    %117 = tpu.strided_load %arg6[%116, %c0_42] {strides = array<i32: 8, 1>} : memref<16x128xf32, #tpu.memory_space<vmem>>, vector<2x128xf32>
    %cst_43 = arith.constant dense<0.000000e+00> : vector<2x128xf32>
    %118 = tpu.matmul %113, %29, %cst_43 {dimension_numbers = #tpu.dot_dimension_numbers<[1], [0], [0], [1], [0, 0, 1, 1], [], []>} : vector<2x32xf32>, vector<32x128xf32>, vector<2x128xf32> -> vector<2x128xf32>
    %119 = arith.addf %117, %118 : vector<2x128xf32>
    %120 = arith.negf %119 : vector<2x128xf32>
    %121 = math.exp %120 : vector<2x128xf32>
    %cst_44 = arith.constant 1.000000e+00 : f32
    %122 = vector.broadcast %cst_44 : f32 to vector<2x128xf32>
    %123 = arith.addf %122, %121 : vector<2x128xf32>
    %124 = arith.divf %122, %123 : vector<2x128xf32>
    %125 = math.tanh %119 : vector<2x128xf32>
    %126 = vector.extract_strided_slice %124 {offsets = [0, 0], sizes = [2, 32], strides = [1, 1]} : vector<2x128xf32> to vector<2x32xf32>
    %127 = vector.extract_strided_slice %124 {offsets = [0, 32], sizes = [2, 32], strides = [1, 1]} : vector<2x128xf32> to vector<2x32xf32>
    %128 = vector.extract_strided_slice %125 {offsets = [0, 64], sizes = [2, 32], strides = [1, 1]} : vector<2x128xf32> to vector<2x32xf32>
    %129 = vector.extract_strided_slice %124 {offsets = [0, 96], sizes = [2, 32], strides = [1, 1]} : vector<2x128xf32> to vector<2x32xf32>
    %130 = arith.mulf %127, %111 : vector<2x32xf32>
    %131 = arith.mulf %126, %128 : vector<2x32xf32>
    %132 = arith.addf %130, %131 : vector<2x32xf32>
    %133 = math.tanh %132 : vector<2x32xf32>
    %134 = arith.mulf %129, %133 : vector<2x32xf32>
    %135 = arith.index_cast %c4_i32 : i32 to index
    %c0_45 = arith.constant 0 : index
    %136 = tpu.strided_load %arg7[%135, %c0_45] {strides = array<i32: 8, 1>} : memref<16x32xf32, #tpu.memory_space<vmem>>, vector<2x32xf32>
    tpu.strided_store %arg7[%135, %c0_45], %134 {strides = array<i32: 8, 1>} : memref<16x32xf32, #tpu.memory_space<vmem>>, vector<2x32xf32>
    %c5_i32 = arith.constant 5 : i32
    %137 = arith.index_cast %c5_i32 : i32 to index
    %c0_46 = arith.constant 0 : index
    %138 = tpu.strided_load %arg6[%137, %c0_46] {strides = array<i32: 8, 1>} : memref<16x128xf32, #tpu.memory_space<vmem>>, vector<2x128xf32>
    %cst_47 = arith.constant dense<0.000000e+00> : vector<2x128xf32>
    %139 = tpu.matmul %134, %29, %cst_47 {dimension_numbers = #tpu.dot_dimension_numbers<[1], [0], [0], [1], [0, 0, 1, 1], [], []>} : vector<2x32xf32>, vector<32x128xf32>, vector<2x128xf32> -> vector<2x128xf32>
    %140 = arith.addf %138, %139 : vector<2x128xf32>
    %141 = arith.negf %140 : vector<2x128xf32>
    %142 = math.exp %141 : vector<2x128xf32>
    %cst_48 = arith.constant 1.000000e+00 : f32
    %143 = vector.broadcast %cst_48 : f32 to vector<2x128xf32>
    %144 = arith.addf %143, %142 : vector<2x128xf32>
    %145 = arith.divf %143, %144 : vector<2x128xf32>
    %146 = math.tanh %140 : vector<2x128xf32>
    %147 = vector.extract_strided_slice %145 {offsets = [0, 0], sizes = [2, 32], strides = [1, 1]} : vector<2x128xf32> to vector<2x32xf32>
    %148 = vector.extract_strided_slice %145 {offsets = [0, 32], sizes = [2, 32], strides = [1, 1]} : vector<2x128xf32> to vector<2x32xf32>
    %149 = vector.extract_strided_slice %146 {offsets = [0, 64], sizes = [2, 32], strides = [1, 1]} : vector<2x128xf32> to vector<2x32xf32>
    %150 = vector.extract_strided_slice %145 {offsets = [0, 96], sizes = [2, 32], strides = [1, 1]} : vector<2x128xf32> to vector<2x32xf32>
    %151 = arith.mulf %148, %132 : vector<2x32xf32>
    %152 = arith.mulf %147, %149 : vector<2x32xf32>
    %153 = arith.addf %151, %152 : vector<2x32xf32>
    %154 = math.tanh %153 : vector<2x32xf32>
    %155 = arith.mulf %150, %154 : vector<2x32xf32>
    %156 = arith.index_cast %c5_i32 : i32 to index
    %c0_49 = arith.constant 0 : index
    %157 = tpu.strided_load %arg7[%156, %c0_49] {strides = array<i32: 8, 1>} : memref<16x32xf32, #tpu.memory_space<vmem>>, vector<2x32xf32>
    tpu.strided_store %arg7[%156, %c0_49], %155 {strides = array<i32: 8, 1>} : memref<16x32xf32, #tpu.memory_space<vmem>>, vector<2x32xf32>
    %c6_i32 = arith.constant 6 : i32
    %158 = arith.index_cast %c6_i32 : i32 to index
    %c0_50 = arith.constant 0 : index
    %159 = tpu.strided_load %arg6[%158, %c0_50] {strides = array<i32: 8, 1>} : memref<16x128xf32, #tpu.memory_space<vmem>>, vector<2x128xf32>
    %cst_51 = arith.constant dense<0.000000e+00> : vector<2x128xf32>
    %160 = tpu.matmul %155, %29, %cst_51 {dimension_numbers = #tpu.dot_dimension_numbers<[1], [0], [0], [1], [0, 0, 1, 1], [], []>} : vector<2x32xf32>, vector<32x128xf32>, vector<2x128xf32> -> vector<2x128xf32>
    %161 = arith.addf %159, %160 : vector<2x128xf32>
    %162 = arith.negf %161 : vector<2x128xf32>
    %163 = math.exp %162 : vector<2x128xf32>
    %cst_52 = arith.constant 1.000000e+00 : f32
    %164 = vector.broadcast %cst_52 : f32 to vector<2x128xf32>
    %165 = arith.addf %164, %163 : vector<2x128xf32>
    %166 = arith.divf %164, %165 : vector<2x128xf32>
    %167 = math.tanh %161 : vector<2x128xf32>
    %168 = vector.extract_strided_slice %166 {offsets = [0, 0], sizes = [2, 32], strides = [1, 1]} : vector<2x128xf32> to vector<2x32xf32>
    %169 = vector.extract_strided_slice %166 {offsets = [0, 32], sizes = [2, 32], strides = [1, 1]} : vector<2x128xf32> to vector<2x32xf32>
    %170 = vector.extract_strided_slice %167 {offsets = [0, 64], sizes = [2, 32], strides = [1, 1]} : vector<2x128xf32> to vector<2x32xf32>
    %171 = vector.extract_strided_slice %166 {offsets = [0, 96], sizes = [2, 32], strides = [1, 1]} : vector<2x128xf32> to vector<2x32xf32>
    %172 = arith.mulf %169, %153 : vector<2x32xf32>
    %173 = arith.mulf %168, %170 : vector<2x32xf32>
    %174 = arith.addf %172, %173 : vector<2x32xf32>
    %175 = math.tanh %174 : vector<2x32xf32>
    %176 = arith.mulf %171, %175 : vector<2x32xf32>
    %177 = arith.index_cast %c6_i32 : i32 to index
    %c0_53 = arith.constant 0 : index
    %178 = tpu.strided_load %arg7[%177, %c0_53] {strides = array<i32: 8, 1>} : memref<16x32xf32, #tpu.memory_space<vmem>>, vector<2x32xf32>
    tpu.strided_store %arg7[%177, %c0_53], %176 {strides = array<i32: 8, 1>} : memref<16x32xf32, #tpu.memory_space<vmem>>, vector<2x32xf32>
    %c7_i32 = arith.constant 7 : i32
    %179 = arith.index_cast %c7_i32 : i32 to index
    %c0_54 = arith.constant 0 : index
    %180 = tpu.strided_load %arg6[%179, %c0_54] {strides = array<i32: 8, 1>} : memref<16x128xf32, #tpu.memory_space<vmem>>, vector<2x128xf32>
    %cst_55 = arith.constant dense<0.000000e+00> : vector<2x128xf32>
    %181 = tpu.matmul %176, %29, %cst_55 {dimension_numbers = #tpu.dot_dimension_numbers<[1], [0], [0], [1], [0, 0, 1, 1], [], []>} : vector<2x32xf32>, vector<32x128xf32>, vector<2x128xf32> -> vector<2x128xf32>
    %182 = arith.addf %180, %181 : vector<2x128xf32>
    %183 = arith.negf %182 : vector<2x128xf32>
    %184 = math.exp %183 : vector<2x128xf32>
    %cst_56 = arith.constant 1.000000e+00 : f32
    %185 = vector.broadcast %cst_56 : f32 to vector<2x128xf32>
    %186 = arith.addf %185, %184 : vector<2x128xf32>
    %187 = arith.divf %185, %186 : vector<2x128xf32>
    %188 = math.tanh %182 : vector<2x128xf32>
    %189 = vector.extract_strided_slice %187 {offsets = [0, 0], sizes = [2, 32], strides = [1, 1]} : vector<2x128xf32> to vector<2x32xf32>
    %190 = vector.extract_strided_slice %187 {offsets = [0, 32], sizes = [2, 32], strides = [1, 1]} : vector<2x128xf32> to vector<2x32xf32>
    %191 = vector.extract_strided_slice %188 {offsets = [0, 64], sizes = [2, 32], strides = [1, 1]} : vector<2x128xf32> to vector<2x32xf32>
    %192 = vector.extract_strided_slice %187 {offsets = [0, 96], sizes = [2, 32], strides = [1, 1]} : vector<2x128xf32> to vector<2x32xf32>
    %193 = arith.mulf %190, %174 : vector<2x32xf32>
    %194 = arith.mulf %189, %191 : vector<2x32xf32>
    %195 = arith.addf %193, %194 : vector<2x32xf32>
    %196 = math.tanh %195 : vector<2x32xf32>
    %197 = arith.mulf %192, %196 : vector<2x32xf32>
    %198 = arith.index_cast %c7_i32 : i32 to index
    %c0_57 = arith.constant 0 : index
    %199 = tpu.strided_load %arg7[%198, %c0_57] {strides = array<i32: 8, 1>} : memref<16x32xf32, #tpu.memory_space<vmem>>, vector<2x32xf32>
    tpu.strided_store %arg7[%198, %c0_57], %197 {strides = array<i32: 8, 1>} : memref<16x32xf32, #tpu.memory_space<vmem>>, vector<2x32xf32>
    %c8_i32 = arith.constant 8 : i32
    %c0_58 = arith.constant 0 : index
    %c0_59 = arith.constant 0 : index
    %200 = vector.load %arg7[%c0_58, %c0_59] : memref<16x32xf32, #tpu.memory_space<vmem>>, vector<16x32xf32>
    %201 = vector.broadcast %4 : vector<1x32xf32> to vector<16x32xf32>
    %202 = arith.mulf %200, %201 : vector<16x32xf32>
    %cst_60 = arith.constant dense<0.000000e+00> : vector<16xf32>
    %203 = vector.multi_reduction <add>, %202, %cst_60 [1] : vector<16x32xf32> to vector<16xf32>
    %204 = vector.shape_cast %203 : vector<16xf32> to vector<16x1xf32>
    %205 = vector.broadcast %8 : vector<1x1xf32> to vector<16x1xf32>
    %206 = arith.addf %204, %205 : vector<16x1xf32>
    %c0_61 = arith.constant 0 : index
    %c0_62 = arith.constant 0 : index
    %207 = vector.load %arg5[%c0_61, %c0_62] : memref<16x1xf32, #tpu.memory_space<vmem>>, vector<16x1xf32>
    tpu.vector_store %arg5[%c0_61, %c0_62], %206 {strides = array<i32>} : memref<16x1xf32, #tpu.memory_space<vmem>>, vector<16x1xf32>,
    return
  }
}

</mosaic_0001>

<bundles_post_ra>
// kernel: tpu_custom_call.1
= control target key start
LH: loop header
LB: loop body
LE: loop exit
PB: predicated region body
PF: predicated region fallthrough
CT: control target
= control target key end

     0   :  { %10 = vsyncpa [#allocation5], 0  ;;  %s1567_s18 = smov [#allocation4]   ;;  %s1750_s0 = inlined_call_operand.vmem [shape: f32[16,4], index: 0, kind: input, shape index: {}]   ;;  %s1751_s1 = inlined_call_operand.vmem [shape: f32[16,1], index: 1, kind: input, shape index: {}]   ;;  %s1752_s2 = inlined_call_operand.vmem [shape: f32[2,32], index: 2, kind: input, shape index: {}]   ;;  %s1753_s3 = inlined_call_operand.vmem [shape: f32[2,32], index: 3, kind: input, shape index: {}]   ;;  %s1754_s4 = inlined_call_operand.hbm [shape: f32[72,128], index: 4, kind: input, shape index: {}]   ;;  %s1755_s5 = inlined_call_operand.vmem [shape: f32[16,1], index: 5, kind: output, shape index: {}]  }
   0x1   :  { %s24_s19 = sshll.u32 %s1567_s18, 4  ;;  %s1543_s22 = scalar_lea.hbm %s1754_s4, 1152  ;;  %s25_s19 = int_to_ptr.vmem [resolvable:$true] %s24_s19 }
   0x2   :  { %p1544_p0 = scmp.ne.s32.totalorder %s1754_s4, %s1543_s22  ;;  %p1547_p1 = scmp.lt.u32.totalorder %s1543_s22, %s1754_s4 }
   0x4   :  { %p1549_p2 = pnand %p1547_p1, %p1544_p0 }
   0x6   :  { %1552 = shalt.err (!%p1549_p2)
}
   0x7   :  { %s1553_s27 = scalar_lea.vmem %s25_s19, 1152  ;;  %p1558_p4 = scmp.lt.s32.totalorder %s25_s19, %s25_s19 }
   0x8   :  { %p1554_p3 = scmp.ne.s32.totalorder %s25_s19, %s1553_s27  ;;  %p1559_p5 = scmp.lt.s32.totalorder %s1553_s27, %s1553_s27 }
   0xa   :  { %p1560_p6 = por %p1559_p5, %p1558_p4 }
   0xc   :  { %p1561_p7 = pnand %p1560_p6, %p1554_p3 }
   0xe   :  { %1564 = shalt.err (!%p1561_p7)
}
   0xf   :  { %s1568_s28 = smov 128   ;;  %s1569_s29 = smov 8  }
  0x10   :  { %30 = dma.hbm_to_vmem [thread:$0]  %s1754_s4, 1152, %s25_s19, [#allocation5], %s1568_s28, %s1568_s28, %s1569_s29  }
  0x11   :  { %1565 = dma.done.wait [#allocation5], 1152  }
  0x12   :  { %1566 = vsyncadd [#allocation5], 4294966144  ;;  %v1570_v0 = vmov 0   ;;  %vm58_vm0 = vcmask 1043456   ;;  %vm51_vm1 = vcmask 31744   ;;  %v43_v2 = vld [vmem:[%s1750_s0] sm:$0xff] }
  0x13   :  { %1478 = vset.pattern.permute.xlu0 %v1570_v0  ;;  %v38_v1 = vld [vmem:[#allocation4 + $0x40] sm:$0xf]  ;;  %v44_v3 = vld [vmem:[%s1750_s0 + $0x8] sm:$0xff]  ;;  %1304 = vmatprep.mubr.msk.f32.mxu0 %vm51_vm1, %v43_v2  ;;  %v45_v4 = vld [vmem:[%s1751_s1] sm:$0xff]  ;;  %s1571_s14 = smov 112   ;;  %v1572_v13 = vmov 0.0|0.0  }
  0x14   :  { %1302 = vmatprep.subr.msk.mxu0 %vm58_vm0, %v38_v1  ;;  %v1629_v5 = vld [vmem:[#allocation4 + $0x47] ss:$0 sm:$0xff]  ;;  %141 = vperm.xlu0 %1478, %v45_v4   ;;  %v46_v6 = vld [vmem:[%s1751_s1 + $0x8] sm:$0xff]  ;;  %v36_v7 = vld [vmem:[#allocation4 + $0x10] sm:$0xff]  ;;  %s1573_s1 = smov 32   ;;  %vm163_vm2 = vcmask 130048  }
  0x15   :  { %1303 = vmatpush3.msk.msra.mxu0 %vm58_vm0, %v38_v1  ;;  %156 = vrot.lane.b32.xlu1 %v1629_v5, %s1571_s14  ;;  %v37_v8 = vld [vmem:[#allocation4 + $0x18] sm:$0xff]  ;;  %v34_v10 = vld [vmem:[#allocation4] sm:$0xff]  ;;  %v35_v11 = vld [vmem:[#allocation4 + $0x8] sm:$0xff]  ;;  %vm1574_vm3 = vmmov 0   ;;  %v1575_v31 = vmov 0.0   ;;  %vm341_vm4 = vcmask 261120  }
  0x16   :  { %1305 = vmatmul.mubr.msk.f32.vlgmr.msra.gmra.mrb[0].mxu0 %vm51_vm1, %v44_v3  ;;  %v1409_v9 = vpack.c.bf16 %v37_v8, %v36_v7  ;;  %v1413_v12 = vpack.c.bf16 %v35_v11, %v34_v10  ;;  %v339_v14 = vld [vmem:[%s1753_s3] sm:$0x3]  ;;  %v1228_v15 = vld [vmem:[#allocation4 + $0x44] ss:$0 sm:$0xff]  ;;  %v335_v24 = vld [vmem:[#allocation4 + $0x28] sm:$0xff]  ;;  %s1577_s17 = smov 96  }
  0x17   :  { %v334_v23 = vld [vmem:[#allocation4 + $0x20] sm:$0xff]  ;;  %v336_v28 = vld [vmem:[#allocation4 + $0x30] sm:$0xff]  ;;  %v337_v29 = vld [vmem:[#allocation4 + $0x38] sm:$0xff]  ;;  %vm1216_vm5 = vcmask 7168  }
  0x18   :  { %146 = vperm.xlu0 %1478, %v46_v6   ;;  %1410 = vmatprep.subr.bf16.mxu0 %v1409_v9  ;;  %v1642_v26 = vpack.c.bf16 %v335_v24, %v334_v23  ;;  %v1646_v30 = vpack.c.bf16 %v337_v29, %v336_v28  ;;  %v338_v32 = vld [vmem:[%s1752_s2] sm:$0x3]  ;;  %v1233_v43 = vld [vmem:[#allocation4 + $0x46] ss:$0 sm:$0xff]  ;;  %s1576_s2 = smov 64  }
  0x19   :  { %1412 = vmatpush3.bf16.msra.mxu0 %v1409_v9  ;;  %1414 = vmatprep.subr.bf16.mxu1 %v1413_v12 }
  0x1a   :  { %1416 = vmatpush3.bf16.msra.mxu1 %v1413_v12  ;;  %1417 = vmatprep.subr.bf16.mxu0 %v1572_v13 }
  0x1b   :  { %1423 = vmatprep.subr.bf16.mxu1 %v1572_v13 }
  0x1c   :  { %424 = vrot.lane.b32.xlu0 %v339_v14, %s1573_s1 }
  0x87   :  { %v157_v17 = vpop.permute.xlu1 %156 }
  0x93   :  { %v142_v16 = vpop.permute.xlu0 %141 }
  0x94   :  { %v153_v18 = vmul.f32 %v1228_v15, %v142_v16 }
  0x96   :  { %v159_v19 = vadd.f32 %v157_v17, %v153_v18 }
  0x97   :  { %v147_v20 = vpop.permute.xlu0 %146 }
  0x98   :  { %v154_v21 = vmul.f32 %v1228_v15, %v147_v20  ;;  %v161_v22 = vmax.f32 %v159_v19, 0.0 }
  0x9a   :  { %v160_v25 = vadd.f32 %v157_v17, %v154_v21  ;;  %1311 = vmatprep.mubr.msk.f32.mxu0 %vm163_vm2, %v161_v22 }
  0x9b   :  { %v425_v59 = vpop.permute.xlu0 %424 }
  0x9c   :  { %v162_v27 = vmax.f32 %v160_v25, 0.0 }
  0x9e   :  { %1312 = vmatmul.mubr.msk.f32.vlgmr.msra.gmra.mrb[2].mxu0 %vm163_vm2, %v162_v27 }
  0x9f   :  { %1419 = vmatpush3.bf16.msra.mxu0 %v1642_v26  ;;  %1329 = vmatprep.mubr.msk.f32.mxu0 %vm1574_vm3, %v1575_v31 }
  0xa0   :  { %1420 = vmatprep.subr.bf16.mxu0 %v1572_v13 }
  0xa3   :  { %1422 = vmatpush3.bf16.msra.mxu0 %v1646_v30 }
  0xa4   :  { %1429 = vmatprep.subr.bf16.mxu0 %v1572_v13 }
  0xa6   :  { %1330 = vmatmul.mubr.msk.f32.vlgmr.msra.gmra.mrb[4].mxu0 %vm341_vm4, %v338_v32 }
  0xa7   :  { %1431 = vmatpush3.bf16.msra.mxu0 %v1642_v26  ;;  %1351 = vmatprep.mubr.msk.f32.mxu0 %vm1574_vm3, %v1575_v31 }
  0xa8   :  { %1432 = vmatprep.subr.bf16.mxu0 %v1572_v13 }
  0xab   :  { %1434 = vmatpush3.bf16.msra.mxu0 %v1646_v30 }
  0xac   :  { %1441 = vmatprep.subr.bf16.mxu0 %v1572_v13 }
  0xe9   :  { %v1306_v33 = vpop.f32.mrb[0].mxu0 }
  0xea   :  { %v134_v34 = vadd.f32 %v1306_v33, %v1629_v5  ;;  %v128_v35 = vpop.f32.mrb[1].mxu0 }
  0xeb   :  { %v129_v36 = vadd.f32 %v1629_v5, %v128_v35 }
  0xec   :  { %v138_v38 = vmax.f32 %v134_v34, 0.0 }
  0xed   :  { %v137_v37 = vmax.f32 %v129_v36, 0.0 }
  0xef   :  { %1318 = vmatprep.mubr.msk.f32.mxu1 %vm163_vm2, %v137_v37 }
  0xf0   :  { %1319 = vmatmul.mubr.msk.f32.vlgmr.msra.gmra.mrb[0].mxu1 %vm163_vm2, %v138_v38 }
  0xf1   :  { %1425 = vmatpush3.bf16.msra.mxu1 %v1642_v26  ;;  %1340 = vmatprep.mubr.msk.f32.mxu1 %vm1574_vm3, %v1575_v31 }
  0xf2   :  { %1426 = vmatprep.subr.bf16.mxu1 %v1572_v13 }
  0xf5   :  { %1428 = vmatpush3.bf16.msra.mxu1 %v1646_v30 }
  0xf6   :  { %1435 = vmatprep.subr.bf16.mxu1 %v1572_v13 }
 0x171   :  { %v1313_v39 = vpop.f32.mrb[2].mxu0 }
 0x172   :  { %v236_v40 = vpop.f32.mrb[3].mxu0 }
 0x179   :  { %v411_v41 = vpop.f32.mrb[4].mxu0 }
 0x17a   :  { %v1331_v42 = vpop.f32.mrb[5].mxu0 }
 0x1c3   :  { %v1320_v44 = vpop.f32.mrb[0].mxu1 }
 0x1c4   :  { %v323_v45 = vadd.f32 %v1320_v44, %v1313_v39  ;;  %v317_v46 = vpop.f32.mrb[1].mxu1 }
 0x1c5   :  { %v318_v47 = vadd.f32 %v317_v46, %v236_v40 }
 0x1c6   :  { %v331_v48 = vadd.f32 %v1233_v43, %v323_v45 }
 0x1c7   :  { %v330_v49 = vadd.f32 %v1233_v43, %v318_v47 }
 0x1c8   :  { %333 = vst [vmem:[#allocation2 + $0x8] sm:$0xff] %v331_v48 }
 0x1c9   :  { %332 = vst [vmem:[#allocation2] sm:$0xff] %v330_v49 }
 0x1d0   :  { %v340_v50 = vld [vmem:[#allocation2] ss:$8 sm:$0x3]  ;;  %v451_v3 = vld [vmem:[#allocation2 + $0x1] ss:$8 sm:$0x3] }
 0x1d1   :  { %v415_v51 = vadd.f32 %v411_v41, %v340_v50  ;;  %v557_v23 = vld [vmem:[#allocation2 + $0x2] ss:$8 sm:$0x3]  ;;  %v663_v44 = vld [vmem:[#allocation2 + $0x3] ss:$8 sm:$0x3] }
 0x1d3   :  { %1479 = vtanh.f32 %v415_v51  ;;  %v1235_v53 = vmul.f32 -1.442695, %v415_v51 }
 0x1d5   :  { %1481 = vpow2.f32 %v1235_v53 }
 0x1dd   :  { %v1480_v52 = vpop.eup %1479 }
 0x1de   :  { %429 = vrot.lane.b32.xlu1 %v1480_v52, %s1576_s2 }
 0x1df   :  { %v1482_v54 = vpop.eup %1481 }
 0x1e0   :  { %v419_v55 = vadd.f32 1.0, %v1482_v54 }
 0x1e2   :  { %1483 = vrcp.f32 %v419_v55 }
 0x1ec   :  { %v1484_v56 = vpop.eup %1483 }
 0x1ed   :  { %v427_v60 = vmul.f32 %v1484_v56, %v425_v59 }
 0x250   :  { %v430_v57 = vpop.permute.xlu1 %429 }
 0x251   :  { %v432_v58 = vmul.f32 %v1484_v56, %v430_v57 }
 0x253   :  { %434 = vrot.lane.b32.xlu1 %v432_v58, %s1573_s1 }
 0x2c5   :  { %v435_v61 = vpop.permute.xlu1 %434 }
 0x2c6   :  { %v437_v62 = vadd.f32 %v435_v61, %v427_v60 }
 0x2c8   :  { %1485 = vtanh.f32 %v437_v62 }
 0x2d2   :  { %v1486_v63 = vpop.eup %1485 }
 0x2d3   :  { %440 = vrot.lane.b32.xlu0 %v1486_v63, %s1576_s2 }
 0x345   :  { %v441_v0 = vpop.permute.xlu0 %440 }
 0x346   :  { %v443_v1 = vmul.f32 %v1484_v56, %v441_v0 }
 0x348   :  { %445 = vrot.lane.b32.xlu1 %v443_v1, %s1573_s1 }
 0x3ba   :  { %v446_v2 = vpop.permute.xlu1 %445 }
 0x3bb   :  { %448 = vst [vmem:[#allocation3] ss:$8 sm:$0x3] %v446_v2  ;;  %1341 = vmatmul.mubr.msk.f32.vlgmr.msra.gmra.mrb[2].mxu1 %vm341_vm4, %v446_v2 }
 0x3bc   :  { %1437 = vmatpush3.bf16.msra.mxu1 %v1642_v26  ;;  %1362 = vmatprep.mubr.msk.f32.mxu1 %vm1574_vm3, %v1575_v31 }
 0x3bd   :  { %1438 = vmatprep.subr.bf16.mxu1 %v1572_v13 }
 0x3c0   :  { %1440 = vmatpush3.bf16.msra.mxu1 %v1646_v30 }
 0x3c1   :  { %1447 = vmatprep.subr.bf16.mxu1 %v1572_v13 }
 0x48e   :  { %v520_v4 = vpop.f32.mrb[2].mxu1 }
 0x48f   :  { %v524_v6 = vadd.f32 %v520_v4, %v451_v3  ;;  %v1342_v7 = vpop.f32.mrb[3].mxu1 }
 0x491   :  { %1487 = vtanh.f32 %v524_v6  ;;  %v1237_v9 = vmul.f32 -1.442695, %v524_v6 }
 0x493   :  { %1489 = vpow2.f32 %v1237_v9 }
 0x49b   :  { %v1488_v8 = vpop.eup %1487 }
 0x49c   :  { %534 = vrot.lane.b32.xlu0 %v1488_v8, %s1576_s2 }
 0x49d   :  { %v1490_v10 = vpop.eup %1489 }
 0x49e   :  { %v528_v11 = vadd.f32 1.0, %v1490_v10 }
 0x4a0   :  { %1491 = vrcp.f32 %v528_v11 }
 0x4aa   :  { %v1492_v12 = vpop.eup %1491 }
 0x4ab   :  { %v532_v16 = vmul.f32 %v1492_v12, %v437_v62  ;;  %v769_v62 = vld [vmem:[#allocation2 + $0x4] ss:$8 sm:$0x3] }
 0x50e   :  { %v535_v14 = vpop.permute.xlu0 %534 }
 0x50f   :  { %v537_v15 = vmul.f32 %v1492_v12, %v535_v14 }
 0x511   :  { %539 = vrot.lane.b32.xlu1 %v537_v15, %s1573_s1 }
 0x583   :  { %v540_v17 = vpop.permute.xlu1 %539 }
 0x584   :  { %v542_v18 = vadd.f32 %v540_v17, %v532_v16 }
 0x586   :  { %1493 = vtanh.f32 %v542_v18 }
 0x590   :  { %v1494_v19 = vpop.eup %1493 }
 0x591   :  { %545 = vrot.lane.b32.xlu0 %v1494_v19, %s1576_s2 }
 0x603   :  { %v546_v20 = vpop.permute.xlu0 %545 }
 0x604   :  { %v548_v21 = vmul.f32 %v1492_v12, %v546_v20 }
 0x606   :  { %550 = vrot.lane.b32.xlu1 %v548_v21, %s1573_s1 }
 0x678   :  { %v551_v22 = vpop.permute.xlu1 %550 }
 0x679   :  { %554 = vst [vmem:[#allocation3 + $0x1] ss:$8 sm:$0x3] %v551_v22  ;;  %1352 = vmatmul.mubr.msk.f32.vlgmr.msra.gmra.mrb[6].mxu0 %vm341_vm4, %v551_v22 }
 0x67a   :  { %1443 = vmatpush3.bf16.msra.mxu0 %v1642_v26  ;;  %1373 = vmatprep.mubr.msk.f32.mxu0 %vm1574_vm3, %v1575_v31 }
 0x67b   :  { %1444 = vmatprep.subr.bf16.mxu0 %v1572_v13 }
 0x67e   :  { %1446 = vmatpush3.bf16.msra.mxu0 %v1646_v30 }
 0x67f   :  { %1453 = vmatprep.subr.bf16.mxu0 %v1572_v13 }
 0x74c   :  { %v626_v24 = vpop.f32.mrb[6].mxu0 }
 0x74d   :  { %v630_v25 = vadd.f32 %v626_v24, %v557_v23  ;;  %v1353_v27 = vpop.f32.mrb[7].mxu0 }
 0x74f   :  { %1495 = vtanh.f32 %v630_v25  ;;  %v1239_v29 = vmul.f32 -1.442695, %v630_v25 }
 0x751   :  { %1497 = vpow2.f32 %v1239_v29 }
 0x759   :  { %v1496_v28 = vpop.eup %1495 }
 0x75a   :  { %640 = vrot.lane.b32.xlu0 %v1496_v28, %s1576_s2 }
 0x75b   :  { %v1498_v32 = vpop.eup %1497 }
 0x75c   :  { %v634_v33 = vadd.f32 1.0, %v1498_v32 }
 0x75e   :  { %1499 = vrcp.f32 %v634_v33 }
 0x768   :  { %v1500_v34 = vpop.eup %1499 }
 0x769   :  { %v638_v37 = vmul.f32 %v1500_v34, %v542_v18  ;;  %v875_v18 = vld [vmem:[#allocation2 + $0x5] ss:$8 sm:$0x3] }
 0x7cc   :  { %v641_v35 = vpop.permute.xlu0 %640 }
 0x7cd   :  { %v643_v36 = vmul.f32 %v1500_v34, %v641_v35  ;;  %v981_v35 = vld [vmem:[#allocation2 + $0x6] ss:$8 sm:$0x3] }
 0x7cf   :  { %645 = vrot.lane.b32.xlu1 %v643_v36, %s1573_s1 }
 0x841   :  { %v646_v38 = vpop.permute.xlu1 %645 }
 0x842   :  { %v648_v39 = vadd.f32 %v646_v38, %v638_v37 }
 0x844   :  { %1501 = vtanh.f32 %v648_v39 }
 0x84e   :  { %v1502_v40 = vpop.eup %1501 }
 0x84f   :  { %651 = vrot.lane.b32.xlu0 %v1502_v40, %s1576_s2 }
 0x8c1   :  { %v652_v41 = vpop.permute.xlu0 %651 }
 0x8c2   :  { %v654_v42 = vmul.f32 %v1500_v34, %v652_v41 }
 0x8c4   :  { %656 = vrot.lane.b32.xlu1 %v654_v42, %s1573_s1 }
 0x936   :  { %v657_v43 = vpop.permute.xlu1 %656 }
 0x937   :  { %660 = vst [vmem:[#allocation3 + $0x2] ss:$8 sm:$0x3] %v657_v43  ;;  %1363 = vmatmul.mubr.msk.f32.vlgmr.msra.gmra.mrb[4].mxu1 %vm341_vm4, %v657_v43 }
 0x938   :  { %1449 = vmatpush3.bf16.msra.mxu1 %v1642_v26  ;;  %1384 = vmatprep.mubr.msk.f32.mxu1 %vm1574_vm3, %v1575_v31 }
 0x939   :  { %1450 = vmatprep.subr.bf16.mxu1 %v1572_v13 }
 0x93c   :  { %1452 = vmatpush3.bf16.msra.mxu1 %v1646_v30 }
 0x93d   :  { %1459 = vmatprep.subr.bf16.mxu1 %v1572_v13 }
 0xa0a   :  { %v732_v45 = vpop.f32.mrb[4].mxu1 }
 0xa0b   :  { %v736_v46 = vadd.f32 %v732_v45, %v663_v44  ;;  %v1364_v47 = vpop.f32.mrb[5].mxu1 }
 0xa0d   :  { %1503 = vtanh.f32 %v736_v46  ;;  %v1241_v49 = vmul.f32 -1.442695, %v736_v46 }
 0xa0f   :  { %1505 = vpow2.f32 %v1241_v49 }
 0xa17   :  { %v1504_v48 = vpop.eup %1503 }
 0xa18   :  { %746 = vrot.lane.b32.xlu0 %v1504_v48, %s1576_s2 }
 0xa19   :  { %v1506_v50 = vpop.eup %1505 }
 0xa1a   :  { %v740_v51 = vadd.f32 1.0, %v1506_v50 }
 0xa1c   :  { %1507 = vrcp.f32 %v740_v51 }
 0xa26   :  { %v1508_v52 = vpop.eup %1507 }
 0xa27   :  { %v744_v55 = vmul.f32 %v1508_v52, %v648_v39 }
 0xa8a   :  { %v747_v53 = vpop.permute.xlu0 %746 }
 0xa8b   :  { %v749_v54 = vmul.f32 %v1508_v52, %v747_v53  ;;  %v1087_v53 = vld [vmem:[#allocation2 + $0x7] ss:$8 sm:$0x3] }
 0xa8d   :  { %751 = vrot.lane.b32.xlu1 %v749_v54, %s1573_s1 }
 0xaff   :  { %v752_v56 = vpop.permute.xlu1 %751 }
 0xb00   :  { %v754_v57 = vadd.f32 %v752_v56, %v744_v55 }
 0xb02   :  { %1509 = vtanh.f32 %v754_v57 }
 0xb0c   :  { %v1510_v58 = vpop.eup %1509 }
 0xb0d   :  { %757 = vrot.lane.b32.xlu0 %v1510_v58, %s1576_s2 }
 0xb7f   :  { %v758_v59 = vpop.permute.xlu0 %757 }
 0xb80   :  { %v760_v60 = vmul.f32 %v1508_v52, %v758_v59 }
 0xb82   :  { %762 = vrot.lane.b32.xlu1 %v760_v60, %s1573_s1 }
 0xbf4   :  { %v763_v61 = vpop.permute.xlu1 %762 }
 0xbf5   :  { %766 = vst [vmem:[#allocation3 + $0x3] ss:$8 sm:$0x3] %v763_v61  ;;  %1374 = vmatmul.mubr.msk.f32.vlgmr.msra.gmra.mrb[8].mxu0 %vm341_vm4, %v763_v61 }
 0xbf6   :  { %1455 = vmatpush3.bf16.msra.mxu0 %v1642_v26  ;;  %1395 = vmatprep.mubr.msk.f32.mxu0 %vm1574_vm3, %v1575_v31 }
 0xbf7   :  { %1456 = vmatprep.subr.bf16.mxu0 %v1572_v13 }
 0xbfa   :  { %1458 = vmatpush3.bf16.msra.mxu0 %v1646_v30 }
 0xcc8   :  { %v838_v63 = vpop.f32.mrb[8].mxu0 }
 0xcc9   :  { %v842_v0 = vadd.f32 %v838_v63, %v769_v62  ;;  %v1375_v1 = vpop.f32.mrb[9].mxu0 }
 0xccb   :  { %1511 = vtanh.f32 %v842_v0  ;;  %v1243_v3 = vmul.f32 -1.442695, %v842_v0 }
 0xccd   :  { %1513 = vpow2.f32 %v1243_v3 }
 0xcd5   :  { %v1512_v2 = vpop.eup %1511 }
 0xcd6   :  { %852 = vrot.lane.b32.xlu0 %v1512_v2, %s1576_s2 }
 0xcd7   :  { %v1514_v4 = vpop.eup %1513 }
 0xcd8   :  { %v846_v6 = vadd.f32 1.0, %v1514_v4 }
 0xcda   :  { %1515 = vrcp.f32 %v846_v6 }
 0xce4   :  { %v1516_v7 = vpop.eup %1515 }
 0xce5   :  { %v850_v10 = vmul.f32 %v1516_v7, %v754_v57 }
 0xd48   :  { %v853_v8 = vpop.permute.xlu0 %852 }
 0xd49   :  { %v855_v9 = vmul.f32 %v1516_v7, %v853_v8  ;;  %v1250_v8 = vld [vmem:[#allocation4 + $0x45] ss:$0 sm:$0xff] }
 0xd4b   :  { %857 = vrot.lane.b32.xlu1 %v855_v9, %s1573_s1 }
 0xdbd   :  { %v858_v11 = vpop.permute.xlu1 %857 }
 0xdbe   :  { %v860_v12 = vadd.f32 %v858_v11, %v850_v10 }
 0xdc0   :  { %1517 = vtanh.f32 %v860_v12 }
 0xdca   :  { %v1518_v14 = vpop.eup %1517 }
 0xdcb   :  { %863 = vrot.lane.b32.xlu0 %v1518_v14, %s1576_s2 }
 0xe3d   :  { %v864_v15 = vpop.permute.xlu0 %863 }
 0xe3e   :  { %v866_v16 = vmul.f32 %v1516_v7, %v864_v15 }
 0xe40   :  { %868 = vrot.lane.b32.xlu1 %v866_v16, %s1573_s1 }
 0xeb2   :  { %v869_v17 = vpop.permute.xlu1 %868 }
 0xeb3   :  { %872 = vst [vmem:[#allocation3 + $0x4] ss:$8 sm:$0x3] %v869_v17  ;;  %1385 = vmatmul.mubr.msk.f32.vlgmr.msra.gmra.mrb[6].mxu1 %vm341_vm4, %v869_v17 }
 0xeb4   :  { %1461 = vmatpush3.bf16.msra.mxu1 %v1642_v26  ;;  %1406 = vmatprep.mubr.msk.f32.mxu1 %vm1574_vm3, %v1575_v31 }
 0xeb5   :  { %1462 = vmatprep.subr.bf16.mxu1 %v1572_v13 }
 0xeb8   :  { %1464 = vmatpush3.bf16.msra.mxu1 %v1646_v30 }
 0xf86   :  { %v944_v19 = vpop.f32.mrb[6].mxu1 }
 0xf87   :  { %v948_v20 = vadd.f32 %v944_v19, %v875_v18  ;;  %v1386_v21 = vpop.f32.mrb[7].mxu1 }
 0xf89   :  { %1519 = vtanh.f32 %v948_v20  ;;  %v1245_v23 = vmul.f32 -1.442695, %v948_v20 }
 0xf8b   :  { %1521 = vpow2.f32 %v1245_v23 }
 0xf93   :  { %v1520_v22 = vpop.eup %1519 }
 0xf94   :  { %958 = vrot.lane.b32.xlu0 %v1520_v22, %s1576_s2 }
 0xf95   :  { %v1522_v24 = vpop.eup %1521 }
 0xf96   :  { %v952_v25 = vadd.f32 1.0, %v1522_v24 }
 0xf98   :  { %1523 = vrcp.f32 %v952_v25 }
 0xfa2   :  { %v1524_v26 = vpop.eup %1523 }
 0xfa3   :  { %v956_v13 = vmul.f32 %v1524_v26, %v860_v12 }
0x1006   :  { %v959_v27 = vpop.permute.xlu0 %958 }
0x1007   :  { %v961_v31 = vmul.f32 %v1524_v26, %v959_v27 }
0x1009   :  { %963 = vrot.lane.b32.xlu1 %v961_v31, %s1573_s1 }
0x107b   :  { %v964_v30 = vpop.permute.xlu1 %963 }
0x107c   :  { %v966_v28 = vadd.f32 %v964_v30, %v956_v13 }
0x107e   :  { %1525 = vtanh.f32 %v966_v28 }
0x1088   :  { %v1526_v29 = vpop.eup %1525 }
0x1089   :  { %969 = vrot.lane.b32.xlu0 %v1526_v29, %s1576_s2 }
0x10fb   :  { %v970_v32 = vpop.permute.xlu0 %969 }
0x10fc   :  { %v972_v33 = vmul.f32 %v1524_v26, %v970_v32 }
0x10fe   :  { %974 = vrot.lane.b32.xlu1 %v972_v33, %s1573_s1 }
0x1170   :  { %v975_v34 = vpop.permute.xlu1 %974 }
0x1171   :  { %978 = vst [vmem:[#allocation3 + $0x5] ss:$8 sm:$0x3] %v975_v34  ;;  %1396 = vmatmul.mubr.msk.f32.vlgmr.msra.gmra.mrb[10].mxu0 %vm341_vm4, %v975_v34 }
0x1244   :  { %v1050_v36 = vpop.f32.mrb[10].mxu0 }
0x1245   :  { %v1054_v37 = vadd.f32 %v1050_v36, %v981_v35  ;;  %v1397_v38 = vpop.f32.mrb[11].mxu0 }
0x1247   :  { %1527 = vtanh.f32 %v1054_v37  ;;  %v1247_v40 = vmul.f32 -1.442695, %v1054_v37 }
0x1249   :  { %1529 = vpow2.f32 %v1247_v40 }
0x1251   :  { %v1528_v39 = vpop.eup %1527 }
0x1252   :  { %1064 = vrot.lane.b32.xlu0 %v1528_v39, %s1576_s2 }
0x1253   :  { %v1530_v41 = vpop.eup %1529 }
0x1254   :  { %v1058_v42 = vadd.f32 1.0, %v1530_v41 }
0x1256   :  { %1531 = vrcp.f32 %v1058_v42 }
0x1260   :  { %v1532_v43 = vpop.eup %1531 }
0x1261   :  { %v1062_v46 = vmul.f32 %v1532_v43, %v966_v28 }
0x12c4   :  { %v1065_v44 = vpop.permute.xlu0 %1064 }
0x12c5   :  { %v1067_v45 = vmul.f32 %v1532_v43, %v1065_v44 }
0x12c7   :  { %1069 = vrot.lane.b32.xlu1 %v1067_v45, %s1573_s1 }
0x1339   :  { %v1070_v47 = vpop.permute.xlu1 %1069 }
0x133a   :  { %v1072_v48 = vadd.f32 %v1070_v47, %v1062_v46 }
0x133c   :  { %1533 = vtanh.f32 %v1072_v48 }
0x1346   :  { %v1534_v49 = vpop.eup %1533 }
0x1347   :  { %1075 = vrot.lane.b32.xlu0 %v1534_v49, %s1576_s2 }
0x13b9   :  { %v1076_v50 = vpop.permute.xlu0 %1075 }
0x13ba   :  { %v1078_v51 = vmul.f32 %v1532_v43, %v1076_v50 }
0x13bc   :  { %1080 = vrot.lane.b32.xlu1 %v1078_v51, %s1573_s1 }
0x142e   :  { %v1081_v52 = vpop.permute.xlu1 %1080 }
0x142f   :  { %1084 = vst [vmem:[#allocation3 + $0x6] ss:$8 sm:$0x3] %v1081_v52  ;;  %1407 = vmatmul.mubr.msk.f32.vlgmr.msra.gmra.mrb[8].mxu1 %vm341_vm4, %v1081_v52 }
0x1502   :  { %v1156_v54 = vpop.f32.mrb[8].mxu1 }
0x1503   :  { %v1160_v55 = vadd.f32 %v1156_v54, %v1087_v53  ;;  %v1408_v56 = vpop.f32.mrb[9].mxu1 }
0x1505   :  { %1535 = vtanh.f32 %v1160_v55  ;;  %v1249_v58 = vmul.f32 -1.442695, %v1160_v55 }
0x1507   :  { %1537 = vpow2.f32 %v1249_v58 }
0x150f   :  { %v1536_v57 = vpop.eup %1535 }
0x1510   :  { %1170 = vrot.lane.b32.xlu0 %v1536_v57, %s1576_s2 }
0x1511   :  { %v1538_v59 = vpop.eup %1537 }
0x1512   :  { %v1164_v60 = vadd.f32 1.0, %v1538_v59 }
0x1514   :  { %1539 = vrcp.f32 %v1164_v60 }
0x151e   :  { %v1540_v61 = vpop.eup %1539 }
0x151f   :  { %v1168_v0 = vmul.f32 %v1540_v61, %v1072_v48 }
0x1582   :  { %v1171_v62 = vpop.permute.xlu0 %1170 }
0x1583   :  { %v1173_v63 = vmul.f32 %v1540_v61, %v1171_v62 }
0x1585   :  { %1175 = vrot.lane.b32.xlu1 %v1173_v63, %s1573_s1 }
0x15f7   :  { %v1176_v1 = vpop.permute.xlu1 %1175 }
0x15f8   :  { %v1178_v2 = vadd.f32 %v1176_v1, %v1168_v0 }
0x15fa   :  { %1541 = vtanh.f32 %v1178_v2 }
0x1604   :  { %v1542_v3 = vpop.eup %1541 }
0x1605   :  { %1181 = vrot.lane.b32.xlu0 %v1542_v3, %s1576_s2 }
0x1677   :  { %v1182_v4 = vpop.permute.xlu0 %1181 }
0x1678   :  { %v1184_v6 = vmul.f32 %v1540_v61, %v1182_v4 }
0x167a   :  { %1186 = vrot.lane.b32.xlu1 %v1184_v6, %s1573_s1 }
0x16ec   :  { %v1187_v7 = vpop.permute.xlu1 %1186 }
0x16ed   :  { %1190 = vst [vmem:[#allocation3 + $0x7] ss:$8 sm:$0x3] %v1187_v7 }
0x16f4   :  { %v1193_v9 = vld [vmem:[#allocation3 + $0x8] sm:$0xff]  ;;  %v1192_v10 = vld [vmem:[#allocation3] sm:$0xff] }
0x16f5   :  { %v1199_v11 = vmul.f32 %v1250_v8, %v1193_v9  ;;  %v1198_v12 = vmul.f32 %v1250_v8, %v1192_v10 }
0x16f7   :  { %v1203_v14 = vsel %vm341_vm4, %v1199_v11, 0.0  ;;  %v1200_v15 = vsel %vm341_vm4, %v1198_v12, 0.0 }
0x16f8   :  { %1204 = vadd.xlane.f32.xlu1 %v1203_v14  ;;  %1201 = vadd.xlane.f32.xlu0 %v1200_v15 }
0x1785   :  { %v1205_v16 = vpop.xlane.xlu1 %1204  ;;  %v1202_v17 = vpop.xlane.xlu0 %1201 }
0x1786   :  { %v1207_v18 = vadd.f32 %v1629_v5, %v1205_v16  ;;  %v1206_v19 = vadd.f32 %v1629_v5, %v1202_v17 }
0x1788   :  { %1212 = vrot.lane.b32.xlu1 %v1207_v18, %s1577_s17  ;;  %1210 = vrot.lane.b32.xlu0 %v1206_v19, %s1577_s17 }
0x17fa   :  { %v1213_v20 = vpop.permute.xlu1 %1212  ;;  %v1211_v21 = vpop.permute.xlu0 %1210 }
0x17fb   :  { %1218 = vst.msk [vmem:[%s1755_s5 + $0x8] sm:$0xff] %vm1216_vm5, %v1213_v20  ;;  %1217 = vst.msk [vmem:[%s1755_s5] sm:$0xff] %vm1216_vm5, %v1211_v21 }
0x17fc   :  { %1223 = vsyncpa [#allocation5], 1 }

</bundles_post_ra>
